<compile_context>
chip_gen: v7x
topology: tpu7x:2x2x1
jax: 0.10.0
libtpu: 0.0.40
codegen_flags: <defaults>
</compile_context>

<pallas_src>
import functools

import jax
import jax.numpy as jnp
from jax.experimental import pallas as pl
from jax.experimental.pallas import tpu as pltpu


def _round_up(x, n):
    return ((x + n - 1) // n) * n


def _cdiv(a, b):
    return (a + b - 1) // b


# ---------------------------------------------------------------------------
# Kernels
# ---------------------------------------------------------------------------

def _mlp_resident_kernel(x_ref, w1_ref, b1_ref, w2_ref, b2_ref, o_ref):
    """linear1 -> relu -> linear2 with both weight matrices resident in VMEM."""
    h = jnp.dot(x_ref[...], w1_ref[...], preferred_element_type=jnp.float32)
    h = jnp.maximum(h + b1_ref[...], 0.0)
    out = jnp.dot(h.astype(w2_ref.dtype), w2_ref[...],
                  preferred_element_type=jnp.float32)
    o_ref[...] = (out + b2_ref[...]).astype(o_ref.dtype)


def _mlp_stream_kernel(x_ref, w1_ref, b1_ref, w2_ref, b2_ref, o_ref, acc_ref):
    """linear1 -> relu -> linear2, streaming the ffn (K) dimension."""
    k = pl.program_id(1)

    @pl.when(k == 0)
    def _():
        acc_ref[...] = jnp.zeros_like(acc_ref)

    h = jnp.dot(x_ref[...], w1_ref[...], preferred_element_type=jnp.float32)
    h = jnp.maximum(h + b1_ref[...], 0.0)
    acc_ref[...] += jnp.dot(h.astype(w2_ref.dtype), w2_ref[...],
                            preferred_element_type=jnp.float32)

    @pl.when(k == pl.num_programs(1) - 1)
    def _():
        o_ref[...] = (acc_ref[...] + b2_ref[...]).astype(o_ref.dtype)


def _mlp_ln_resident_kernel(x_ref, w1_ref, b1_ref, w2_ref, b2_ref, g_ref,
                            beta_ref, o_ref, *, eps):
    """linear1 -> relu -> LayerNorm -> linear2 (full ffn row resident)."""
    h = jnp.dot(x_ref[...], w1_ref[...], preferred_element_type=jnp.float32)
    h = jnp.maximum(h + b1_ref[...], 0.0)
    # Single-pass LayerNorm stats in f32 (unbiased=False), matches PyTorch.
    mean = jnp.mean(h, axis=-1, keepdims=True)
    msq = jnp.mean(h * h, axis=-1, keepdims=True)
    var = jnp.maximum(msq - mean * mean, 0.0)
    hn = g_ref[...] * (h - mean) * jax.lax.rsqrt(var + eps) + beta_ref[...]
    out = jnp.dot(hn.astype(w2_ref.dtype), w2_ref[...],
                  preferred_element_type=jnp.float32)
    o_ref[...] = (out + b2_ref[...]).astype(o_ref.dtype)


def _mlp_ln_stream_kernel(x_ref, w1_ref, b1_ref, w2_ref, b2_ref, g_ref,
                          beta_ref, o_ref, h_ref, s_ref, ss_ref, acc_ref,
                          *, eps, ffn_dim, tk):
    """Streaming LN path; grid = (m_tile, phase, k).

    phase 0: h slab = relu(x @ W1[:, k*tk:] + b1) -> stash in h_ref, accumulate
             row sum / sum-of-squares.
    phase 1: normalize each stashed slab with full-row stats and accumulate
             slab @ W2[k*tk:, :] into the f32 output accumulator.
    """
    p = pl.program_id(1)
    k = pl.program_id(2)
    col = pl.multiple_of(k * tk, 128)

    @pl.when((p == 0) & (k == 0))
    def _():
        s_ref[...] = jnp.zeros_like(s_ref)
        ss_ref[...] = jnp.zeros_like(ss_ref)
        acc_ref[...] = jnp.zeros_like(acc_ref)

    @pl.when(p == 0)
    def _():
        h = jnp.dot(x_ref[...], w1_ref[...], preferred_element_type=jnp.float32)
        h = jnp.maximum(h + b1_ref[...], 0.0)
        h_ref[:, pl.ds(col, tk)] = h
        s_ref[...] += jnp.sum(h, axis=-1, keepdims=True)
        ss_ref[...] += jnp.sum(h * h, axis=-1, keepdims=True)

    @pl.when(p == 1)
    def _():
        inv_n = 1.0 / ffn_dim
        mean = s_ref[...] * inv_n
        var = jnp.maximum(ss_ref[...] * inv_n - mean * mean, 0.0)
        rstd = jax.lax.rsqrt(var + eps)
        h = h_ref[:, pl.ds(col, tk)]
        hn = g_ref[...] * (h - mean) * rstd + beta_ref[...]
        acc_ref[...] += jnp.dot(hn.astype(w2_ref.dtype), w2_ref[...],
                                preferred_element_type=jnp.float32)

        @pl.when(k == pl.num_programs(2) - 1)
        def _():
            o_ref[...] = (acc_ref[...] + b2_ref[...]).astype(o_ref.dtype)


# ---------------------------------------------------------------------------
# Wrapper
# ---------------------------------------------------------------------------

def _device_kind():
    try:
        return jax.devices()[0].device_kind.lower()
    except Exception:
        return ""


def _default_vmem_limit(kind):
    # v7x has 64 MiB VMEM per TensorCore -> request 48 MiB and leave headroom
    # for compiler-internal scratch; v5e/v6e have 128 MiB -> 100 MiB.
    if "v7" in kind:
        return 48 * 1024 * 1024
    return 100 * 1024 * 1024


def _pick_tk(ffn_dim, tile_ffn, fits):
    """Largest multiple-of-128 divisor of ffn_dim <= tile_ffn whose working set
    fits the VMEM budget (falls back to the smallest such divisor)."""
    top = (min(tile_ffn, ffn_dim) // 128) * 128
    cands = [d for d in range(top, 0, -128) if ffn_dim % d == 0]
    if not cands:
        return None
    for d in cands:
        if fits(d):
            return d
    return cands[-1]


def mlp_pallas(x, w1, b1, w2, b2, gamma=None, beta=None, *,
               post_act_ln=False, eps=1e-5,
               tile_m=None, tile_ffn=2048,
               compute_dtype=jnp.bfloat16,
               vmem_limit_bytes=None,
               mode=None,                       # None/'auto' | 'resident' | 'stream'
               single_buffer_weights=True):
    """x: (..., dim) -> (..., d_model_out) in x.dtype.

    Weights are (in_features, out_features).  Pass weights already stored in
    `compute_dtype` (e.g. bf16) to avoid a per-call HBM re-cast of W1/W2.
    """
    # TODO(synk): training-mode dropout (stateful PRNG mask + 1/(1-p) scaling).
    dim = x.shape[-1]
    ffn_dim = w1.shape[1]
    d_out = w2.shape[1]
    lead_shape = x.shape[:-1]
    out_dtype = x.dtype
    out_size = jnp.dtype(out_dtype).itemsize
    csize = jnp.dtype(compute_dtype).itemsize

    kind = _device_kind()
    is_v7 = "v7" in kind
    if vmem_limit_bytes is None:
        vmem_limit_bytes = _default_vmem_limit(kind)
    budget = int(vmem_limit_bytes * 0.85)        # headroom for pipeline bookkeeping

    x2d = x.reshape(-1, dim)
    m = x2d.shape[0]
    m8 = max(8, _round_up(m, 8))

    # ---- mode / tile selection (conservative: assume double-buffered) ------
    w_bytes = (dim * ffn_dim + ffn_dim * d_out) * csize + (ffn_dim + d_out) * 4
    if post_act_ln:
        w_bytes += 2 * ffn_dim * 4               # gamma, beta

    def _resident_fits(tm):
        inter = tm * ffn_dim * ((8 if post_act_ln else 4) + csize)   # h (+ hn) spill
        acts = 2 * tm * (dim * csize + d_out * out_size)
        return 2 * w_bytes + inter + acts <= budget

    tile_m_res = 256 if tile_m is None else _round_up(tile_m, 8)
    tile_m_str = 512 if tile_m is None else _round_up(tile_m, 8)

    resident = _resident_fits(min(tile_m_res, m8))
    if mode == "resident":
        resident = True
    elif mode == "stream":
        resident = False

    tk = None
    if not resident:
        def _make_fits(tm):
            def fits(tk_):
                per = (2 * (tm * dim * csize                     # x (2 bufs)
                            + (dim + d_out) * tk_ * csize        # W1 / W2 slabs
                            + (tk_ + d_out) * 4                  # b1 slab, b2
                            + tm * d_out * out_size)             # out (2 bufs)
                       + tm * d_out * 4                          # f32 accumulator
                       + tm * tk_ * (4 + csize))                 # h slab
                if post_act_ln:
                    per += tm * ffn_dim * 4 + 8 * tm + 4 * 4 * tk_   # h stash + stats + gamma/beta
                return per <= budget
            return fits

        chosen = None
        for tm_try in (tile_m_str, 256, 128, 64):
            tm_try = max(8, min(tm_try, m8))
            fits = _make_fits(tm_try)
            tk_try = _pick_tk(ffn_dim, tile_ffn, fits)
            if tk_try is None:
                break                             # ffn has no multiple-of-128 divisor
            chosen = (tm_try, tk_try)
            if fits(tk_try):
                break
        if chosen is None:
            resident = True                       # whole-ffn blocks are the only option
        else:
            tile_m, tk = chosen

    if resident:
        tile_m = max(8, min(tile_m_res, m8))

    # v7x: two TensorCores per chip -> keep the parallel M axis even.
    if is_v7 and m > 8:
        gm = _cdiv(m, tile_m)
        if gm % 2 == 1:
            tile_m = max(8, _round_up(_cdiv(m, gm + 1), 8))

    m_pad = _round_up(m, tile_m)
    grid_m = m_pad // tile_m
    if m_pad != m:
        x2d = jnp.pad(x2d, ((0, m_pad - m), (0, 0)))

    # ---- operand preparation ------------------------------------------------
    def _cast(a, dt):
        return a if a.dtype == dt else a.astype(dt)

    x2d = _cast(x2d, compute_dtype)
    w1c = _cast(w1, compute_dtype)                # no-op when stored in compute dtype
    w2c = _cast(w2, compute_dtype)
    b1f = _cast(b1.reshape(1, ffn_dim), jnp.float32)
    b2f = _cast(b2.reshape(1, d_out), jnp.float32)

    weight_passes = 1 if resident else grid_m
    cost = pl.CostEstimate(
        flops=2 * m_pad * ffn_dim * (dim + d_out),
        transcendentals=(m_pad if post_act_ln else 0),
        bytes_accessed=int(m_pad * dim * csize + weight_passes * w_bytes
                           + m_pad * d_out * out_size))

    def _cparams(sem):
        return pltpu.CompilerParams(dimension_semantics=sem,
                                    vmem_limit_bytes=vmem_limit_bytes)

    def _const_spec(shape, single):
        zeros = (0,) * len(shape)
        if single:
            # Block never changes across the grid -> hold one VMEM copy only.
            return pl.BlockSpec(shape, lambda *_: zeros,
                                pipeline_mode=pl.Buffered(1))
        return pl.BlockSpec(shape, lambda *_: zeros)

    def _run(build, args):
        if single_buffer_weights and hasattr(pl, "Buffered"):
            try:
                return build(True)(*args)
            except Exception:
                pass                              # fall back to default buffering
        return build(False)(*args)

    # ---- dispatch -----------------------------------------------------------
    if post_act_ln:
        gf = (jnp.ones((1, ffn_dim), jnp.float32) if gamma is None
              else _cast(gamma.reshape(1, ffn_dim), jnp.float32))
        bf = (jnp.zeros((1, ffn_dim), jnp.float32) if beta is None
              else _cast(beta.reshape(1, ffn_dim), jnp.float32))

        if resident:
            kernel = functools.partial(_mlp_ln_resident_kernel, eps=eps)

            def build(single):
                return pl.pallas_call(
                    kernel,
                    out_shape=jax.ShapeDtypeStruct((m_pad, d_out), out_dtype),
                    grid_spec=pltpu.PrefetchScalarGridSpec(
                        num_scalar_prefetch=0,
                        grid=(grid_m,),
                        in_specs=[
                            pl.BlockSpec((tile_m, dim), lambda i: (i, 0)),
                            _const_spec((dim, ffn_dim), single),
                            _const_spec((1, ffn_dim), single),
                            _const_spec((ffn_dim, d_out), single),
                            _const_spec((1, d_out), single),
                            _const_spec((1, ffn_dim), single),
                            _const_spec((1, ffn_dim), single),
                        ],
                        out_specs=pl.BlockSpec((tile_m, d_out), lambda i: (i, 0)),
                    ),
                    compiler_params=_cparams(("parallel",)),
                    cost_estimate=cost,
                )

            out2d = _run(build, (x2d, w1c, b1f, w2c, b2f, gf, bf))
        else:
            n_k = ffn_dim // tk
            kernel = functools.partial(_mlp_ln_stream_kernel, eps=eps,
                                       ffn_dim=ffn_dim, tk=tk)

            def build(single):
                del single
                return pl.pallas_call(
                    kernel,
                    out_shape=jax.ShapeDtypeStruct((m_pad, d_out), out_dtype),
                    grid_spec=pltpu.PrefetchScalarGridSpec(
                        num_scalar_prefetch=0,
                        grid=(grid_m, 2, n_k),
                        in_specs=[
                            pl.BlockSpec((tile_m, dim), lambda i, p, k: (i, 0)),
                            # phase 0 walks W1/b1 slabs; phase 1 parks on the
                            # last slab (already resident -> no re-fetch).
                            pl.BlockSpec((dim, tk),
                                         lambda i, p, k: (0, k + p * (n_k - 1 - k))),
                            pl.BlockSpec((1, tk),
                                         lambda i, p, k: (0, k + p * (n_k - 1 - k))),
                            # phase 1 walks W2/gamma/beta slabs; phase 0 parks on slab 0.
                            pl.BlockSpec((tk, d_out), lambda i, p, k: (k * p, 0)),
                            pl.BlockSpec((1, d_out), lambda i, p, k: (0, 0)),
                            pl.BlockSpec((1, tk), lambda i, p, k: (0, k * p)),
                            pl.BlockSpec((1, tk), lambda i, p, k: (0, k * p)),
                        ],
                        out_specs=pl.BlockSpec((tile_m, d_out),
                                               lambda i, p, k: (i, 0)),
                        scratch_shapes=[
                            pltpu.VMEM((tile_m, ffn_dim), jnp.float32),  # h stash
                            pltpu.VMEM((tile_m, 1), jnp.float32),        # row sum
                            pltpu.VMEM((tile_m, 1), jnp.float32),        # row sumsq
                            pltpu.VMEM((tile_m, d_out), jnp.float32),    # out acc
                        ],
                    ),
                    compiler_params=_cparams(("parallel", "arbitrary", "arbitrary")),
                    cost_estimate=cost,
                )

            out2d = _run(build, (x2d, w1c, b1f, w2c, b2f, gf, bf))
    else:
        if resident:
            def build(single):
                return pl.pallas_call(
                    _mlp_resident_kernel,
                    out_shape=jax.ShapeDtypeStruct((m_pad, d_out), out_dtype),
                    grid_spec=pltpu.PrefetchScalarGridSpec(
                        num_scalar_prefetch=0,
                        grid=(grid_m,),
                        in_specs=[
                            pl.BlockSpec((tile_m, dim), lambda i: (i, 0)),
                            _const_spec((dim, ffn_dim), single),
                            _const_spec((1, ffn_dim), single),
                            _const_spec((ffn_dim, d_out), single),
                            _const_spec((1, d_out), single),
                        ],
                        out_specs=pl.BlockSpec((tile_m, d_out), lambda i: (i, 0)),
                    ),
                    compiler_params=_cparams(("parallel",)),
                    cost_estimate=cost,
                )

            out2d = _run(build, (x2d, w1c, b1f, w2c, b2f))
        else:
            def build(single):
                del single
                return pl.pallas_call(
                    _mlp_stream_kernel,
                    out_shape=jax.ShapeDtypeStruct((m_pad, d_out), out_dtype),
                    grid_spec=pltpu.PrefetchScalarGridSpec(
                        num_scalar_prefetch=0,
                        grid=(grid_m, ffn_dim // tk),
                        in_specs=[
                            pl.BlockSpec((tile_m, dim), lambda i, k: (i, 0)),
                            pl.BlockSpec((dim, tk), lambda i, k: (0, k)),
                            pl.BlockSpec((1, tk), lambda i, k: (0, k)),
                            pl.BlockSpec((tk, d_out), lambda i, k: (k, 0)),
                            pl.BlockSpec((1, d_out), lambda i, k: (0, 0)),
                        ],
                        out_specs=pl.BlockSpec((tile_m, d_out), lambda i, k: (i, 0)),
                        scratch_shapes=[pltpu.VMEM((tile_m, d_out), jnp.float32)],
                    ),
                    compiler_params=_cparams(("parallel", "arbitrary")),
                    cost_estimate=cost,
                )

            out2d = _run(build, (x2d, w1c, b1f, w2c, b2f))

    out2d = out2d[:m]
    return out2d.reshape(*lead_shape, d_out)


# ---------------------------------------------------------------------------
# Parameter init + reference
# ---------------------------------------------------------------------------

def init_mlp_params(key, dim, ffn_dim, d_model_out=None, dtype=jnp.float32):
    """Deterministic init mimicking nn.Linear default (uniform +/- 1/sqrt(fan_in))."""
    d_model_out = d_model_out or dim
    k1, k2, k3, k4 = jax.random.split(key, 4)
    bound1 = 1.0 / jnp.sqrt(dim)
    bound2 = 1.0 / jnp.sqrt(ffn_dim)
    w1 = jax.random.uniform(k1, (dim, ffn_dim), dtype, -bound1, bound1)
    b1 = jax.random.uniform(k2, (1, ffn_dim), dtype, -bound1, bound1)
    w2 = jax.random.uniform(k3, (ffn_dim, d_model_out), dtype, -bound2, bound2)
    b2 = jax.random.uniform(k4, (1, d_model_out), dtype, -bound2, bound2)
    gamma = jnp.ones((1, ffn_dim), dtype)    # LayerNorm a_2
    beta = jnp.zeros((1, ffn_dim), dtype)    # LayerNorm b_2
    return w1, b1, w2, b2, gamma, beta


def mlp_reference(x, w1, b1, w2, b2, gamma, beta, *, post_act_ln=False, eps=1e-5):
    h = jnp.maximum(x @ w1 + b1.reshape(-1), 0.0)
    if post_act_ln:
        mean = jnp.mean(h, axis=-1, keepdims=True)
        var = jnp.mean((h - mean) ** 2, axis=-1, keepdims=True)
        h = gamma.reshape(-1) * (h - mean) / jnp.sqrt(var + eps) + beta.reshape(-1)
    return h @ w2 + b2.reshape(-1)


if __name__ == "__main__":
    key = jax.random.PRNGKey(0)
    kx, kp = jax.random.split(key)

    batch, seq, dim, ffn_dim = 2, 8, 32, 256
    x = jax.random.normal(kx, (batch, seq, dim), jnp.float32)
    params = init_mlp_params(kp, dim, ffn_dim)
    ref = mlp_reference(x, *params, post_act_ln=False)
    ref_ln = mlp_reference(x, *params, post_act_ln=True)

    # 1. Weights-resident path, f32 compute (tight tolerance).
    out = jax.block_until_ready(
        mlp_pallas(x, *params, post_act_ln=False, compute_dtype=jnp.float32))
    assert out.shape == (batch, seq, dim)
    assert jnp.allclose(out, ref, atol=1e-4, rtol=1e-4)

    # 2. Forced ffn-streaming path (K accumulation), f32 compute.
    out = jax.block_until_ready(
        mlp_pallas(x, *params, post_act_ln=False, compute_dtype=jnp.float32,
                   mode="stream", tile_ffn=128))
    assert jnp.allclose(out, ref, atol=1e-4, rtol=1e-4)

    # 3. Fused post-activation LayerNorm, resident, f32 compute.
    out = jax.block_until_ready(
        mlp_pallas(x, *params, post_act_ln=True, compute_dtype=jnp.float32))
    assert jnp.allclose(out, ref_ln, atol=1e-4, rtol=1e-4)

    # 4. Forced two-phase streaming LayerNorm path, f32 compute.
    out = jax.block_until_ready(
        mlp_pallas(x, *params, post_act_ln=True, compute_dtype=jnp.float32,
                   mode="stream", tile_ffn=128))
    assert jnp.allclose(out, ref_ln, atol=1e-4, rtol=1e-4)

    # 5. Default fast path: bf16 MXU operands with f32 accumulation.
    out = jax.block_until_ready(mlp_pallas(x, *params, post_act_ln=False))
    assert out.shape == (batch, seq, dim)
    assert jnp.allclose(out, ref, atol=5e-2, rtol=5e-2)

    print("KERNEL_OK")
</pallas_src>

<mosaic_0001>
module attributes {stable_mosaic.version = 11 : i64} {
  func.func @_mlp_resident_kernel(%arg0: i32, %arg1: memref<16x32xf32, #tpu.memory_space<vmem>>, %arg2: memref<32x256xf32, #tpu.memory_space<vmem>>, %arg3: memref<1x256xf32, #tpu.memory_space<vmem>>, %arg4: memref<256x32xf32, #tpu.memory_space<vmem>>, %arg5: memref<1x32xf32, #tpu.memory_space<vmem>>, %arg6: memref<16x32xf32, #tpu.memory_space<vmem>>) attributes {dimension_semantics = [#tpu.dimension_semantics<parallel>], iteration_bounds = array<i64: 1>, scalar_prefetch = 0 : i64, scratch_operands = 0 : i64, tpu.core_type = #tpu.core_type<tc>, window_params = [{transform_indices = @transform_0, window_bounds = array<i64: 16, 32>}, {pipeline_mode = #tpu.pipeline_mode<synchronous>, transform_indices = @transform_1, window_bounds = array<i64: 32, 256>}, {pipeline_mode = #tpu.pipeline_mode<synchronous>, transform_indices = @transform_2, window_bounds = array<i64: 1, 256>}, {pipeline_mode = #tpu.pipeline_mode<synchronous>, transform_indices = @transform_3, window_bounds = array<i64: 256, 32>}, {pipeline_mode = #tpu.pipeline_mode<synchronous>, transform_indices = @transform_4, window_bounds = array<i64: 1, 32>}, {transform_indices = @transform_5, window_bounds = array<i64: 16, 32>}]} {
    %c0 = arith.constant 0 : index
    %c0_0 = arith.constant 0 : index
    %0 = vector.load %arg1[%c0, %c0_0] : memref<16x32xf32, #tpu.memory_space<vmem>>, vector<16x32xf32>
    %c0_1 = arith.constant 0 : index
    %c0_2 = arith.constant 0 : index
    %1 = vector.load %arg2[%c0_1, %c0_2] : memref<32x256xf32, #tpu.memory_space<vmem>>, vector<32x256xf32>
    %cst = arith.constant dense<0.000000e+00> : vector<16x256xf32>
    %2 = tpu.matmul %0, %1, %cst {dimension_numbers = #tpu.dot_dimension_numbers<[1], [0], [0], [1], [0, 0, 1, 1], [], []>} : vector<16x32xf32>, vector<32x256xf32>, vector<16x256xf32> -> vector<16x256xf32>
    %c0_3 = arith.constant 0 : index
    %c0_4 = arith.constant 0 : index
    %3 = vector.load %arg3[%c0_3, %c0_4] : memref<1x256xf32, #tpu.memory_space<vmem>>, vector<1x256xf32>
    %4 = vector.broadcast %3 : vector<1x256xf32> to vector<16x256xf32>
    %5 = arith.addf %2, %4 : vector<16x256xf32>
    %cst_5 = arith.constant 0.000000e+00 : f32
    %6 = vector.broadcast %cst_5 : f32 to vector<16x256xf32>
    %7 = arith.maximumf %5, %6 : vector<16x256xf32>
    %c0_6 = arith.constant 0 : index
    %c0_7 = arith.constant 0 : index
    %8 = vector.load %arg4[%c0_6, %c0_7] : memref<256x32xf32, #tpu.memory_space<vmem>>, vector<256x32xf32>
    %cst_8 = arith.constant dense<0.000000e+00> : vector<16x32xf32>
    %9 = tpu.matmul %7, %8, %cst_8 {dimension_numbers = #tpu.dot_dimension_numbers<[1], [0], [0], [1], [0, 0, 1, 1], [], []>} : vector<16x256xf32>, vector<256x32xf32>, vector<16x32xf32> -> vector<16x32xf32>
    %c0_9 = arith.constant 0 : index
    %c0_10 = arith.constant 0 : index
    %10 = vector.load %arg5[%c0_9, %c0_10] : memref<1x32xf32, #tpu.memory_space<vmem>>, vector<1x32xf32>
    %11 = vector.broadcast %10 : vector<1x32xf32> to vector<16x32xf32>
    %12 = arith.addf %9, %11 : vector<16x32xf32>
    %c0_11 = arith.constant 0 : index
    %c0_12 = arith.constant 0 : index
    %13 = vector.load %arg6[%c0_11, %c0_12] : memref<16x32xf32, #tpu.memory_space<vmem>>, vector<16x32xf32>
    tpu.vector_store %arg6[%c0_11, %c0_12], %12 {strides = array<i32>} : memref<16x32xf32, #tpu.memory_space<vmem>>, vector<16x32xf32>,
    return
  }
  func.func @transform_0(%arg0: i32) -> (i32, i32) {
    %c0_i32 = arith.constant 0 : i32
    %c0_i32_0 = arith.constant 0 : i32
    return %arg0, %c0_i32 : i32, i32
  }
  func.func @transform_1(%arg0: i32) -> (i32, i32) {
    %c0_i32 = arith.constant 0 : i32
    %c0_i32_0 = arith.constant 0 : i32
    %c0_i32_1 = arith.constant 0 : i32
    return %c0_i32, %c0_i32_0 : i32, i32
  }
  func.func @transform_2(%arg0: i32) -> (i32, i32) {
    %c0_i32 = arith.constant 0 : i32
    %c0_i32_0 = arith.constant 0 : i32
    %c0_i32_1 = arith.constant 0 : i32
    return %c0_i32, %c0_i32_0 : i32, i32
  }
  func.func @transform_3(%arg0: i32) -> (i32, i32) {
    %c0_i32 = arith.constant 0 : i32
    %c0_i32_0 = arith.constant 0 : i32
    %c0_i32_1 = arith.constant 0 : i32
    return %c0_i32, %c0_i32_0 : i32, i32
  }
  func.func @transform_4(%arg0: i32) -> (i32, i32) {
    %c0_i32 = arith.constant 0 : i32
    %c0_i32_0 = arith.constant 0 : i32
    %c0_i32_1 = arith.constant 0 : i32
    return %c0_i32, %c0_i32_0 : i32, i32
  }
  func.func @transform_5(%arg0: i32) -> (i32, i32) {
    %c0_i32 = arith.constant 0 : i32
    %c0_i32_0 = arith.constant 0 : i32
    return %arg0, %c0_i32 : i32, i32
  }
}

module attributes {stable_mosaic.version = 11 : i64} {
  func.func @_mlp_resident_kernel(%arg0: i32, %arg1: memref<16x32xf32, #tpu.memory_space<vmem>>, %arg2: memref<32x256xf32, #tpu.memory_space<vmem>>, %arg3: memref<1x256xf32, #tpu.memory_space<vmem>>, %arg4: memref<256x32xf32, #tpu.memory_space<vmem>>, %arg5: memref<1x32xf32, #tpu.memory_space<vmem>>, %arg6: memref<16x32xf32, #tpu.memory_space<vmem>>) attributes {dimension_semantics = [#tpu.dimension_semantics<parallel>], iteration_bounds = array<i64: 1>, scalar_prefetch = 0 : i64, scratch_operands = 0 : i64, tpu.core_type = #tpu.core_type<tc>, window_params = [{transform_indices = @transform_0, window_bounds = array<i64: 16, 32>}, {pipeline_mode = #tpu.pipeline_mode<synchronous>, transform_indices = @transform_1, window_bounds = array<i64: 32, 256>}, {pipeline_mode = #tpu.pipeline_mode<synchronous>, transform_indices = @transform_2, window_bounds = array<i64: 1, 256>}, {pipeline_mode = #tpu.pipeline_mode<synchronous>, transform_indices = @transform_3, window_bounds = array<i64: 256, 32>}, {pipeline_mode = #tpu.pipeline_mode<synchronous>, transform_indices = @transform_4, window_bounds = array<i64: 1, 32>}, {transform_indices = @transform_5, window_bounds = array<i64: 16, 32>}]} {
    %c0 = arith.constant 0 : index
    %c0_0 = arith.constant 0 : index
    %0 = vector.load %arg1[%c0, %c0_0] : memref<16x32xf32, #tpu.memory_space<vmem>>, vector<16x32xf32>
    %c0_1 = arith.constant 0 : index
    %c0_2 = arith.constant 0 : index
    %1 = vector.load %arg2[%c0_1, %c0_2] : memref<32x256xf32, #tpu.memory_space<vmem>>, vector<32x256xf32>
    %cst = arith.constant dense<0.000000e+00> : vector<16x256xf32>
    %2 = tpu.matmul %0, %1, %cst {dimension_numbers = #tpu.dot_dimension_numbers<[1], [0], [0], [1], [0, 0, 1, 1], [], []>} : vector<16x32xf32>, vector<32x256xf32>, vector<16x256xf32> -> vector<16x256xf32>
    %c0_3 = arith.constant 0 : index
    %c0_4 = arith.constant 0 : index
    %3 = vector.load %arg3[%c0_3, %c0_4] : memref<1x256xf32, #tpu.memory_space<vmem>>, vector<1x256xf32>
    %4 = vector.broadcast %3 : vector<1x256xf32> to vector<16x256xf32>
    %5 = arith.addf %2, %4 : vector<16x256xf32>
    %cst_5 = arith.constant 0.000000e+00 : f32
    %6 = vector.broadcast %cst_5 : f32 to vector<16x256xf32>
    %7 = arith.maximumf %5, %6 : vector<16x256xf32>
    %c0_6 = arith.constant 0 : index
    %c0_7 = arith.constant 0 : index
    %8 = vector.load %arg4[%c0_6, %c0_7] : memref<256x32xf32, #tpu.memory_space<vmem>>, vector<256x32xf32>
    %cst_8 = arith.constant dense<0.000000e+00> : vector<16x32xf32>
    %9 = tpu.matmul %7, %8, %cst_8 {dimension_numbers = #tpu.dot_dimension_numbers<[1], [0], [0], [1], [0, 0, 1, 1], [], []>} : vector<16x256xf32>, vector<256x32xf32>, vector<16x32xf32> -> vector<16x32xf32>
    %c0_9 = arith.constant 0 : index
    %c0_10 = arith.constant 0 : index
    %10 = vector.load %arg5[%c0_9, %c0_10] : memref<1x32xf32, #tpu.memory_space<vmem>>, vector<1x32xf32>
    %11 = vector.broadcast %10 : vector<1x32xf32> to vector<16x32xf32>
    %12 = arith.addf %9, %11 : vector<16x32xf32>
    %c0_11 = arith.constant 0 : index
    %c0_12 = arith.constant 0 : index
    %13 = vector.load %arg6[%c0_11, %c0_12] : memref<16x32xf32, #tpu.memory_space<vmem>>, vector<16x32xf32>
    tpu.vector_store %arg6[%c0_11, %c0_12], %12 {strides = array<i32>} : memref<16x32xf32, #tpu.memory_space<vmem>>, vector<16x32xf32>,
    return
  }
  func.func @transform_0(%arg0: i32) -> (i32, i32) {
    %c0_i32 = arith.constant 0 : i32
    %c0_i32_0 = arith.constant 0 : i32
    return %arg0, %c0_i32 : i32, i32
  }
  func.func @transform_1(%arg0: i32) -> (i32, i32) {
    %c0_i32 = arith.constant 0 : i32
    %c0_i32_0 = arith.constant 0 : i32
    %c0_i32_1 = arith.constant 0 : i32
    return %c0_i32, %c0_i32_0 : i32, i32
  }
  func.func @transform_2(%arg0: i32) -> (i32, i32) {
    %c0_i32 = arith.constant 0 : i32
    %c0_i32_0 = arith.constant 0 : i32
    %c0_i32_1 = arith.constant 0 : i32
    return %c0_i32, %c0_i32_0 : i32, i32
  }
  func.func @transform_3(%arg0: i32) -> (i32, i32) {
    %c0_i32 = arith.constant 0 : i32
    %c0_i32_0 = arith.constant 0 : i32
    %c0_i32_1 = arith.constant 0 : i32
    return %c0_i32, %c0_i32_0 : i32, i32
  }
  func.func @transform_4(%arg0: i32) -> (i32, i32) {
    %c0_i32 = arith.constant 0 : i32
    %c0_i32_0 = arith.constant 0 : i32
    %c0_i32_1 = arith.constant 0 : i32
    return %c0_i32, %c0_i32_0 : i32, i32
  }
  func.func @transform_5(%arg0: i32) -> (i32, i32) {
    %c0_i32 = arith.constant 0 : i32
    %c0_i32_0 = arith.constant 0 : i32
    return %arg0, %c0_i32 : i32, i32
  }
}

</mosaic_0001>

<bundles_post_ra>
// kernel: tpu_custom_call.1
= control target key start
LH: loop header
LB: loop body
LE: loop exit
PB: predicated region body
PF: predicated region fallthrough
CT: control target
= control target key end

     0   :  { %10 = vsyncpa [#allocation3], 0  ;;  %s688_s0 = inlined_call_operand.hbm [shape: f32[16,32], index: 0, kind: input, shape index: {}]   ;;  %s689_s1 = inlined_call_operand.hbm [shape: f32[32,256], index: 1, kind: input, shape index: {}]   ;;  %s690_s2 = inlined_call_operand.hbm [shape: f32[1,256], index: 2, kind: input, shape index: {}]   ;;  %s691_s3 = inlined_call_operand.hbm [shape: f32[256,32], index: 3, kind: input, shape index: {}]   ;;  %s692_s4 = inlined_call_operand.hbm [shape: f32[1,32], index: 4, kind: input, shape index: {}]   ;;  %s693_s5 = inlined_call_operand.hbm [shape: f32[16,32], index: 5, kind: output, shape index: {}]  }
   0x1   :  { %11 = vsyncpa [#allocation6], 0 }
   0x2   :  { %12 = vsyncpa [#allocation9], 0 }
   0x3   :  { %13 = vsyncpa [#allocation4], 0  ;;  %s562_s18 = smov [#allocation5]   ;;  %s422_s22 = scalar_lea.hbm %s689_s1, 1024 }
   0x4   :  { %s31_s19 = sshll.u32 %s562_s18, 4  ;;  %p423_p0 = scmp.ne.s32.totalorder %s689_s1, %s422_s22  ;;  %s32_s19 = int_to_ptr.vmem [resolvable:$true] %s31_s19 }
   0x5   :  { %p426_p1 = scmp.lt.u32.totalorder %s422_s22, %s689_s1 }
   0x7   :  { %p428_p2 = pnand %p426_p1, %p423_p0 }
   0x9   :  { %431 = shalt.err (!%p428_p2)
}
   0xa   :  { %s432_s27 = scalar_lea.vmem %s32_s19, 1024  ;;  %p437_p4 = scmp.lt.s32.totalorder %s32_s19, %s32_s19 }
   0xb   :  { %p433_p3 = scmp.ne.s32.totalorder %s32_s19, %s432_s27  ;;  %p438_p5 = scmp.lt.s32.totalorder %s432_s27, %s432_s27 }
   0xd   :  { %p439_p6 = por %p438_p5, %p437_p4 }
   0xf   :  { %p440_p7 = pnand %p439_p6, %p433_p3 }
  0x11   :  { %443 = shalt.err (!%p440_p7)
}
  0x12   :  { %s563_s28 = smov 256   ;;  %s564_s29 = smov 16  }
  0x13   :  { %37 = dma.hbm_to_vmem [thread:$0]  %s689_s1, 1024, %s32_s19, [#allocation6], %s563_s28, %s563_s28, %s564_s29  }
  0x14   :  { %s565_s7 = smov [#allocation8]   ;;  %s566_s9 = smov [#allocation2]  }
  0x15   :  { %s53_s8 = sshll.u32 %s565_s7, 4  ;;  %s19_s10 = sshll.u32 %s566_s9, 4  ;;  %s54_s8 = int_to_ptr.vmem [resolvable:$true] %s53_s8  ;;  %s20_s10 = int_to_ptr.vmem [resolvable:$true] %s19_s10 }
  0x16   :  { %s444_s13 = scalar_lea.hbm %s691_s3, 4096 }
  0x17   :  { %p445_p8 = scmp.ne.s32.totalorder %s691_s3, %s444_s13  ;;  %p448_p9 = scmp.lt.u32.totalorder %s444_s13, %s691_s3 }
  0x19   :  { %p450_p10 = pnand %p448_p9, %p445_p8 }
  0x1b   :  { %453 = shalt.err (!%p450_p10)
}
  0x1c   :  { %s454_s1 = scalar_lea.vmem %s54_s8, 4096  ;;  %p459_p12 = scmp.lt.s32.totalorder %s54_s8, %s54_s8 }
  0x1d   :  { %p455_p11 = scmp.ne.s32.totalorder %s54_s8, %s454_s1  ;;  %p460_p13 = scmp.lt.s32.totalorder %s454_s1, %s454_s1 }
  0x1f   :  { %p461_p0 = por %p460_p13, %p459_p12 }
  0x21   :  { %p462_p1 = pnand %p461_p0, %p455_p11 }
  0x23   :  { %465 = shalt.err (!%p462_p1)
}
  0x24   :  { %s567_s18 = smov 128   ;;  %s568_s19 = smov 8  }
  0x25   :  { %59 = dma.hbm_to_vmem [thread:$0]  %s691_s3, 4096, %s54_s8, [#allocation9], %s567_s18, %s567_s18, %s568_s19  }
  0x26   :  { %s466_s24 = scalar_lea.hbm %s688_s0, 256 }
  0x27   :  { %p467_p2 = scmp.ne.s32.totalorder %s688_s0, %s466_s24  ;;  %p470_p3 = scmp.lt.u32.totalorder %s466_s24, %s688_s0 }
  0x29   :  { %p472_p4 = pnand %p470_p3, %p467_p2 }
  0x2b   :  { %475 = shalt.err (!%p472_p4)
}
  0x2c   :  { %s476_s29 = scalar_lea.vmem %s20_s10, 256  ;;  %p481_p6 = scmp.lt.s32.totalorder %s20_s10, %s20_s10 }
  0x2d   :  { %p477_p5 = scmp.ne.s32.totalorder %s20_s10, %s476_s29  ;;  %p482_p7 = scmp.lt.s32.totalorder %s476_s29, %s476_s29 }
  0x2f   :  { %p483_p8 = por %p482_p7, %p481_p6 }
  0x31   :  { %p484_p9 = pnand %p483_p8, %p477_p5 }
  0x33   :  { %487 = shalt.err (!%p484_p9)
}
  0x34   :  { %25 = dma.hbm_to_vmem [thread:$0]  %s688_s0, 256, %s20_s10, [#allocation3], %s567_s18, %s567_s18, %s568_s19  }
  0x35   :  { %s569_s6 = smov [#allocation7]   ;;  %s570_s8 = smov [#allocation10]  }
  0x36   :  { %s44_s7 = sshll.u32 %s569_s6, 4  ;;  %s66_s9 = sshll.u32 %s570_s8, 4  ;;  %s45_s7 = int_to_ptr.vmem [resolvable:$true] %s44_s7  ;;  %s67_s9 = int_to_ptr.vmem [resolvable:$true] %s66_s9 }
  0x37   :  { %s488_s13 = scalar_lea.hbm %s690_s2, 32 }
  0x38   :  { %p489_p10 = scmp.ne.s32.totalorder %s690_s2, %s488_s13  ;;  %p492_p11 = scmp.lt.u32.totalorder %s488_s13, %s690_s2 }
  0x3a   :  { %p494_p12 = pnand %p492_p11, %p489_p10 }
  0x3c   :  { %497 = shalt.err (!%p494_p12)
}
  0x3d   :  { %s498_s0 = scalar_lea.vmem %s45_s7, 32  ;;  %p503_p0 = scmp.lt.s32.totalorder %s45_s7, %s45_s7 }
  0x3e   :  { %p499_p13 = scmp.ne.s32.totalorder %s45_s7, %s498_s0  ;;  %p504_p1 = scmp.lt.s32.totalorder %s498_s0, %s498_s0 }
  0x40   :  { %p505_p2 = por %p504_p1, %p503_p0 }
  0x42   :  { %p506_p3 = pnand %p505_p2, %p499_p13 }
  0x44   :  { %509 = shalt.err (!%p506_p3)
}
  0x45   :  { %47 = dma.hbm_to_vmem [thread:$0]  %s690_s2, 32, %s45_s7, [#allocation6]  }
  0x46   :  { %s510_s22 = scalar_lea.hbm %s692_s4, 16 }
  0x47   :  { %p511_p4 = scmp.ne.s32.totalorder %s692_s4, %s510_s22  ;;  %p514_p5 = scmp.lt.u32.totalorder %s510_s22, %s692_s4 }
  0x49   :  { %p516_p6 = pnand %p514_p5, %p511_p4 }
  0x4b   :  { %519 = shalt.err (!%p516_p6)
}
  0x4c   :  { %s520_s27 = scalar_lea.vmem %s67_s9, 16  ;;  %s524_s28 = scalar_lea.vmem %s67_s9, 32 }
  0x4d   :  { %p521_p7 = scmp.ne.s32.totalorder %s67_s9, %s520_s27  ;;  %p525_p8 = scmp.lt.s32.totalorder %s67_s9, %s67_s9 }
  0x4e   :  { %p526_p9 = scmp.lt.s32.totalorder %s524_s28, %s520_s27 }
  0x50   :  { %p527_p10 = por %p526_p9, %p525_p8 }
  0x52   :  { %p528_p11 = pnand %p527_p10, %p521_p7 }
  0x54   :  { %531 = shalt.err (!%p528_p11)
}
  0x55   :  { %69 = dma.hbm_to_vmem [thread:$0]  %s692_s4, 16, %s67_s9, [#allocation9]  }
  0x56   :  { %554 = dma.done.wait [#allocation3], 256  }
  0x57   :  { %555 = vsyncadd [#allocation3], 4294967040 }
  0x58   :  { %556 = dma.done.wait [#allocation6], 1056  }
  0x59   :  { %557 = vsyncadd [#allocation6], 4294966240 }
  0x5a   :  { %558 = dma.done.wait [#allocation9], 4112  }
  0x5b   :  { %559 = vsyncadd [#allocation9], 4294963184  ;;  %v571_v0 = vmov 0.0   ;;  %v88_v1 = vld [vmem:[#allocation5 + $0x8] sm:$0xff]  ;;  %v90_v2 = vld [vmem:[#allocation5 + $0x18] sm:$0xff]  ;;  %vm107_vm0 = vcmask 261120   ;;  %v97_v63 = vlaneseq }
  0x5c   :  { %178 = vmatprep.mubr.f32.mxu0 %v571_v0  ;;  %v87_v3 = vld [vmem:[#allocation5] sm:$0xff]  ;;  %v371_v4 = vpack.c.bf16 %v90_v2, %v88_v1  ;;  %v89_v5 = vld [vmem:[#allocation5 + $0x10] sm:$0xff]  ;;  %v92_v6 = vld [vmem:[#allocation5 + $0x28] sm:$0xff]  ;;  %s572_s4 = smov [#allocation11]  }
  0x5d   :  { %v94_v7 = vld [vmem:[#allocation5 + $0x38] sm:$0xff]  ;;  %v373_v8 = vpack.c.bf16 %v89_v5, %v87_v3  ;;  %v91_v10 = vld [vmem:[#allocation5 + $0x20] sm:$0xff]  ;;  %v93_v11 = vld [vmem:[#allocation5 + $0x30] sm:$0xff]  ;;  %s316_s3 = sshll.u32 %s572_s4, 4  ;;  %s317_s3 = int_to_ptr.vmem [resolvable:$true] %s316_s3 }
  0x5e   :  { %v375_v9 = vpack.c.bf16 %v94_v7, %v92_v6  ;;  %372 = vmatprep.subr.bf16.mxu0 %v371_v4  ;;  %v211_v12 = vld [vmem:[#allocation8 + $0x80] sm:$0xff]  ;;  %v212_v13 = vld [vmem:[#allocation8 + $0x88] sm:$0xff]  ;;  %v377_v14 = vpack.c.bf16 %v93_v11, %v91_v10  ;;  %v213_v18 = vld [vmem:[#allocation8 + $0x90] sm:$0xff]  ;;  %s532_s30 = scalar_lea.vmem %s317_s3, 256  ;;  %p537_p13 = scmp.lt.s32.totalorder %s317_s3, %s317_s3 }
  0x5f   :  { %374 = vmatpush1.bf16.msra.mxu0 %v373_v8  ;;  %v379_v15 = vpack.c.bf16 %v212_v13, %v211_v12  ;;  %v195_v16 = vld [vmem:[#allocation8] sm:$0xff]  ;;  %v196_v17 = vld [vmem:[#allocation8 + $0x8] sm:$0xff]  ;;  %v214_v20 = vld [vmem:[#allocation8 + $0x98] sm:$0xff]  ;;  %p533_p12 = scmp.ne.s32.totalorder %s317_s3, %s532_s30  ;;  %p538_p0 = scmp.lt.s32.totalorder %s532_s30, %s532_s30 }
  0x60   :  { %376 = vmatprep.subr.bf16.mxu0 %v375_v9  ;;  %v381_v19 = vpack.c.bf16 %v196_v17, %v195_v16  ;;  %v197_v21 = vld [vmem:[#allocation8 + $0x10] sm:$0xff]  ;;  %v198_v22 = vld [vmem:[#allocation8 + $0x18] sm:$0xff]  ;;  %v383_v23 = vpack.c.bf16 %v214_v20, %v213_v18  ;;  %v215_v24 = vld [vmem:[#allocation8 + $0xa0] sm:$0xff] }
  0x61   :  { %380 = vmatprep.subr.bf16.mxu1 %v379_v15  ;;  %v216_v25 = vld [vmem:[#allocation8 + $0xa8] sm:$0xff]  ;;  %v385_v26 = vpack.c.bf16 %v198_v22, %v197_v21  ;;  %v199_v29 = vld [vmem:[#allocation8 + $0x20] sm:$0xff]  ;;  %v217_v31 = vld [vmem:[#allocation8 + $0xb0] sm:$0xff]  ;;  %p539_p1 = por %p538_p0, %p537_p13 }
  0x62   :  { %382 = vmatpush3.bf16.msra.mxu1 %v381_v19  ;;  %v85_v27 = vld [vmem:[#allocation2] sm:$0xff]  ;;  %v387_v28 = vpack.c.bf16 %v216_v25, %v215_v24  ;;  %v218_v32 = vld [vmem:[#allocation8 + $0xb8] sm:$0xff]  ;;  %v219_v38 = vld [vmem:[#allocation8 + $0xc0] sm:$0xff] }
  0x63   :  { %378 = vmatpush1.bf16.msra.mxu0 %v377_v14  ;;  %384 = vmatprep.subr.bf16.mxu1 %v383_v23  ;;  %v200_v30 = vld [vmem:[#allocation8 + $0x28] sm:$0xff]  ;;  %v86_v34 = vld [vmem:[#allocation2 + $0x8] sm:$0xff]  ;;  %v391_v35 = vpack.c.bf16 %v218_v32, %v217_v31  ;;  %v203_v42 = vld [vmem:[#allocation8 + $0x40] sm:$0xff]  ;;  %p540_p2 = pnand %p539_p1, %p533_p12 }
  0x64   :  { %v389_v33 = vpack.c.bf16 %v200_v30, %v199_v29  ;;  %v201_v36 = vld [vmem:[#allocation8 + $0x30] sm:$0xff]  ;;  %v202_v37 = vld [vmem:[#allocation8 + $0x38] sm:$0xff]  ;;  %v220_v39 = vld [vmem:[#allocation8 + $0xc8] sm:$0xff] }
  0x65   :  { %v393_v40 = vpack.c.bf16 %v202_v37, %v201_v36  ;;  %v395_v41 = vpack.c.bf16 %v220_v39, %v219_v38  ;;  %v204_v43 = vld [vmem:[#allocation8 + $0x48] sm:$0xff]  ;;  %v221_v44 = vld [vmem:[#allocation8 + $0xd0] sm:$0xff]  ;;  %v222_v45 = vld [vmem:[#allocation8 + $0xd8] sm:$0xff] }
  0x66   :  { %330 = vmatmul.mubr.msk.f32.vlgmr.msra.gmra.mrb[0].mxu0 %vm107_vm0, %v85_v27  ;;  %386 = vmatpush3.bf16.msra.mxu1 %v385_v26  ;;  %v397_v46 = vpack.c.bf16 %v204_v43, %v203_v42  ;;  %v399_v47 = vpack.c.bf16 %v222_v45, %v221_v44  ;;  %v205_v48 = vld [vmem:[#allocation8 + $0x50] sm:$0xff]  ;;  %v206_v49 = vld [vmem:[#allocation8 + $0x58] sm:$0xff]  ;;  %v223_v50 = vld [vmem:[#allocation8 + $0xe0] sm:$0xff] }
  0x67   :  { %184 = vmatprep.mubr.f32.mxu0 %v571_v0  ;;  %388 = vmatprep.subr.bf16.mxu1 %v387_v28  ;;  %v224_v51 = vld [vmem:[#allocation8 + $0xe8] sm:$0xff]  ;;  %v401_v52 = vpack.c.bf16 %v206_v49, %v205_v48  ;;  %v207_v54 = vld [vmem:[#allocation8 + $0x60] sm:$0xff]  ;;  %v225_v57 = vld [vmem:[#allocation8 + $0xf0] sm:$0xff]  ;;  %v98_v0 = vshrl.u32 %v97_v63, 7 }
  0x68   :  { %v403_v53 = vpack.c.bf16 %v224_v51, %v223_v50  ;;  %v208_v55 = vld [vmem:[#allocation8 + $0x68] sm:$0xff]  ;;  %v226_v58 = vld [vmem:[#allocation8 + $0xf8] sm:$0xff]  ;;  %v209_v60 = vld [vmem:[#allocation8 + $0x70] sm:$0xff] }
  0x69   :  { %v405_v56 = vpack.c.bf16 %v208_v55, %v207_v54  ;;  %v407_v59 = vpack.c.bf16 %v226_v58, %v225_v57  ;;  %v210_v61 = vld [vmem:[#allocation8 + $0x78] sm:$0xff]  ;;  %v99_v1 = vsub.s32 0, %v98_v0  ;;  %v103_v3 = vsub.s32 1, %v98_v0  ;;  %v332_v19 = vld [vmem:[#allocation10] ss:$0 sm:$0xff] }
  0x6a   :  { %331 = vmatmul.mubr.msk.f32.gmra.mrb[2].mxu0 %vm107_vm0, %v86_v34  ;;  %390 = vmatpush3.bf16.msra.mxu1 %v389_v33  ;;  %v409_v62 = vpack.c.bf16 %v210_v61, %v209_v60  ;;  %v95_v2 = vld [vmem:[#allocation7] sm:$0x3] }
  0x6b   :  { %392 = vmatprep.subr.bf16.mxu1 %v391_v35  ;;  %v100_v4 = vrot.slane %v95_v2, %v99_v1  ;;  %v104_v5 = vrot.slane %v95_v2, %v103_v3 }
  0x6e   :  { %394 = vmatpush3.bf16.msra.mxu1 %v393_v40 }
  0x6f   :  { %396 = vmatprep.subr.bf16.mxu1 %v395_v41 }
  0x72   :  { %398 = vmatpush3.bf16.msra.mxu1 %v397_v46 }
  0x73   :  { %400 = vmatprep.subr.bf16.mxu1 %v399_v47 }
  0x76   :  { %402 = vmatpush3.bf16.msra.mxu1 %v401_v52 }
  0x77   :  { %404 = vmatprep.subr.bf16.mxu1 %v403_v53 }
  0x7a   :  { %406 = vmatpush3.bf16.msra.mxu1 %v405_v56 }
  0x7b   :  { %408 = vmatprep.subr.bf16.mxu1 %v407_v59 }
  0x7e   :  { %410 = vmatpush3.bf16.msra.mxu1 %v409_v62 }
 0x139   :  { %v180_v6 = vpop.f32.mrb[0].mxu0 }
 0x13a   :  { %v181_v7 = vadd.f32 %v180_v6, %v100_v4  ;;  %v182_v8 = vpop.f32.mrb[1].mxu0 }
 0x13b   :  { %v183_v9 = vadd.f32 %v182_v8, %v104_v5 }
 0x13c   :  { %v191_v12 = vmax.f32 %v181_v7, 0.0 }
 0x13d   :  { %v186_v10 = vpop.f32.mrb[2].mxu0  ;;  %v192_v11 = vmax.f32 %v183_v9, 0.0 }
 0x13e   :  { %v187_v13 = vadd.f32 %v186_v10, %v100_v4  ;;  %v188_v14 = vpop.f32.mrb[3].mxu0 }
 0x13f   :  { %v189_v15 = vadd.f32 %v188_v14, %v104_v5  ;;  %298 = vmatprep.mubr.f32.mxu1 %v192_v11 }
 0x140   :  { %299 = vmatmul.mubr.f32.vlgmr.msra.gmra.mrb[0].mxu1 %v191_v12  ;;  %v193_v17 = vmax.f32 %v187_v13, 0.0 }
 0x141   :  { %v194_v16 = vmax.f32 %v189_v15, 0.0 }
 0x143   :  { %303 = vmatprep.mubr.f32.mxu1 %v194_v16 }
 0x144   :  { %304 = vmatmul.mubr.f32.gmra.mrb[2].mxu1 %v193_v17 }
 0x213   :  { %v365_v18 = vpop.f32.mrb[0].mxu1 }
 0x214   :  { %v366_v20 = vpop.f32.mrb[1].mxu1 }
 0x215   :  { %v367_v21 = vadd.f32 %v366_v20, %v365_v18 }
 0x217   :  { %v301_v22 = vadd.f32 %v367_v21, %v332_v19  ;;  %v368_v23 = vpop.f32.mrb[2].mxu1 }
 0x218   :  { %v369_v24 = vpop.f32.mrb[3].mxu1 }
 0x219   :  { %309 = vst.msk [vmem:[#allocation11] sm:$0xff] %vm107_vm0, %v301_v22  ;;  %v370_v25 = vadd.f32 %v369_v24, %v368_v23 }
 0x21b   :  { %v306_v26 = vadd.f32 %v370_v25, %v332_v19 }
 0x21d   :  { %310 = vst.msk [vmem:[#allocation11 + $0x8] sm:$0xff] %vm107_vm0, %v306_v26 }
 0x21e   :  { %543 = shalt.err (!%p540_p2)
}
 0x21f   :  { %s544_s8 = scalar_lea.hbm %s693_s5, 256 }
 0x220   :  { %p545_p3 = scmp.ne.s32.totalorder %s693_s5, %s544_s8  ;;  %p548_p4 = scmp.lt.u32.totalorder %s544_s8, %s693_s5 }
 0x222   :  { %p550_p5 = pnand %p548_p4, %p545_p3 }
 0x224   :  { %553 = shalt.err (!%p550_p5)
}
 0x225   :  { %322 = dma.vmem_to_hbm [thread:$0]  %s317_s3, 256, %s693_s5, [#allocation4], %s567_s18, %s567_s18, %s568_s19  }
 0x226   :  { %560 = dma.done.wait [#allocation4], 256  }
 0x227   :  { %561 = vsyncadd [#allocation4], 4294967040 }
 0x228   :  { %326 = vsyncpa [#allocation3], 1 }
 0x229   :  { %327 = vsyncpa [#allocation6], 1 }
 0x22a   :  { %328 = vsyncpa [#allocation9], 1 }
 0x22b   :  { %329 = vsyncpa [#allocation4], 1 }

// kernel: tpu_custom_call.1
= control target key start
LH: loop header
LB: loop body
LE: loop exit
PB: predicated region body
PF: predicated region fallthrough
CT: control target
= control target key end

     0   :  { %10 = vsyncpa [#allocation3], 0  ;;  %s688_s0 = inlined_call_operand.hbm [shape: f32[16,32], index: 0, kind: input, shape index: {}]   ;;  %s689_s1 = inlined_call_operand.hbm [shape: f32[32,256], index: 1, kind: input, shape index: {}]   ;;  %s690_s2 = inlined_call_operand.hbm [shape: f32[1,256], index: 2, kind: input, shape index: {}]   ;;  %s691_s3 = inlined_call_operand.hbm [shape: f32[256,32], index: 3, kind: input, shape index: {}]   ;;  %s692_s4 = inlined_call_operand.hbm [shape: f32[1,32], index: 4, kind: input, shape index: {}]   ;;  %s693_s5 = inlined_call_operand.hbm [shape: f32[16,32], index: 5, kind: output, shape index: {}]  }
   0x1   :  { %11 = vsyncpa [#allocation6], 0 }
   0x2   :  { %12 = vsyncpa [#allocation9], 0 }
   0x3   :  { %13 = vsyncpa [#allocation4], 0  ;;  %s562_s18 = smov [#allocation5]   ;;  %s422_s22 = scalar_lea.hbm %s689_s1, 1024 }
   0x4   :  { %s31_s19 = sshll.u32 %s562_s18, 4  ;;  %p423_p0 = scmp.ne.s32.totalorder %s689_s1, %s422_s22  ;;  %s32_s19 = int_to_ptr.vmem [resolvable:$true] %s31_s19 }
   0x5   :  { %p426_p1 = scmp.lt.u32.totalorder %s422_s22, %s689_s1 }
   0x7   :  { %p428_p2 = pnand %p426_p1, %p423_p0 }
   0x9   :  { %431 = shalt.err (!%p428_p2)
}
   0xa   :  { %s432_s27 = scalar_lea.vmem %s32_s19, 1024  ;;  %p437_p4 = scmp.lt.s32.totalorder %s32_s19, %s32_s19 }
   0xb   :  { %p433_p3 = scmp.ne.s32.totalorder %s32_s19, %s432_s27  ;;  %p438_p5 = scmp.lt.s32.totalorder %s432_s27, %s432_s27 }
   0xd   :  { %p439_p6 = por %p438_p5, %p437_p4 }
   0xf   :  { %p440_p7 = pnand %p439_p6, %p433_p3 }
  0x11   :  { %443 = shalt.err (!%p440_p7)
}
  0x12   :  { %s563_s28 = smov 256   ;;  %s564_s29 = smov 16  }
  0x13   :  { %37 = dma.hbm_to_vmem [thread:$0]  %s689_s1, 1024, %s32_s19, [#allocation6], %s563_s28, %s563_s28, %s564_s29  }
  0x14   :  { %s565_s7 = smov [#allocation8]   ;;  %s566_s9 = smov [#allocation2]  }
  0x15   :  { %s53_s8 = sshll.u32 %s565_s7, 4  ;;  %s19_s10 = sshll.u32 %s566_s9, 4  ;;  %s54_s8 = int_to_ptr.vmem [resolvable:$true] %s53_s8  ;;  %s20_s10 = int_to_ptr.vmem [resolvable:$true] %s19_s10 }
  0x16   :  { %s444_s13 = scalar_lea.hbm %s691_s3, 4096 }
  0x17   :  { %p445_p8 = scmp.ne.s32.totalorder %s691_s3, %s444_s13  ;;  %p448_p9 = scmp.lt.u32.totalorder %s444_s13, %s691_s3 }
  0x19   :  { %p450_p10 = pnand %p448_p9, %p445_p8 }
  0x1b   :  { %453 = shalt.err (!%p450_p10)
}
  0x1c   :  { %s454_s1 = scalar_lea.vmem %s54_s8, 4096  ;;  %p459_p12 = scmp.lt.s32.totalorder %s54_s8, %s54_s8 }
  0x1d   :  { %p455_p11 = scmp.ne.s32.totalorder %s54_s8, %s454_s1  ;;  %p460_p13 = scmp.lt.s32.totalorder %s454_s1, %s454_s1 }
  0x1f   :  { %p461_p0 = por %p460_p13, %p459_p12 }
  0x21   :  { %p462_p1 = pnand %p461_p0, %p455_p11 }
  0x23   :  { %465 = shalt.err (!%p462_p1)
}
  0x24   :  { %s567_s18 = smov 128   ;;  %s568_s19 = smov 8  }
  0x25   :  { %59 = dma.hbm_to_vmem [thread:$0]  %s691_s3, 4096, %s54_s8, [#allocation9], %s567_s18, %s567_s18, %s568_s19  }
  0x26   :  { %s466_s24 = scalar_lea.hbm %s688_s0, 256 }
  0x27   :  { %p467_p2 = scmp.ne.s32.totalorder %s688_s0, %s466_s24  ;;  %p470_p3 = scmp.lt.u32.totalorder %s466_s24, %s688_s0 }
  0x29   :  { %p472_p4 = pnand %p470_p3, %p467_p2 }
  0x2b   :  { %475 = shalt.err (!%p472_p4)
}
  0x2c   :  { %s476_s29 = scalar_lea.vmem %s20_s10, 256  ;;  %p481_p6 = scmp.lt.s32.totalorder %s20_s10, %s20_s10 }
  0x2d   :  { %p477_p5 = scmp.ne.s32.totalorder %s20_s10, %s476_s29  ;;  %p482_p7 = scmp.lt.s32.totalorder %s476_s29, %s476_s29 }
  0x2f   :  { %p483_p8 = por %p482_p7, %p481_p6 }
  0x31   :  { %p484_p9 = pnand %p483_p8, %p477_p5 }
  0x33   :  { %487 = shalt.err (!%p484_p9)
}
  0x34   :  { %25 = dma.hbm_to_vmem [thread:$0]  %s688_s0, 256, %s20_s10, [#allocation3], %s567_s18, %s567_s18, %s568_s19  }
  0x35   :  { %s569_s6 = smov [#allocation7]   ;;  %s570_s8 = smov [#allocation10]  }
  0x36   :  { %s44_s7 = sshll.u32 %s569_s6, 4  ;;  %s66_s9 = sshll.u32 %s570_s8, 4  ;;  %s45_s7 = int_to_ptr.vmem [resolvable:$true] %s44_s7  ;;  %s67_s9 = int_to_ptr.vmem [resolvable:$true] %s66_s9 }
  0x37   :  { %s488_s13 = scalar_lea.hbm %s690_s2, 32 }
  0x38   :  { %p489_p10 = scmp.ne.s32.totalorder %s690_s2, %s488_s13  ;;  %p492_p11 = scmp.lt.u32.totalorder %s488_s13, %s690_s2 }
  0x3a   :  { %p494_p12 = pnand %p492_p11, %p489_p10 }
  0x3c   :  { %497 = shalt.err (!%p494_p12)
}
  0x3d   :  { %s498_s0 = scalar_lea.vmem %s45_s7, 32  ;;  %p503_p0 = scmp.lt.s32.totalorder %s45_s7, %s45_s7 }
  0x3e   :  { %p499_p13 = scmp.ne.s32.totalorder %s45_s7, %s498_s0  ;;  %p504_p1 = scmp.lt.s32.totalorder %s498_s0, %s498_s0 }
  0x40   :  { %p505_p2 = por %p504_p1, %p503_p0 }
  0x42   :  { %p506_p3 = pnand %p505_p2, %p499_p13 }
  0x44   :  { %509 = shalt.err (!%p506_p3)
}
  0x45   :  { %47 = dma.hbm_to_vmem [thread:$0]  %s690_s2, 32, %s45_s7, [#allocation6]  }
  0x46   :  { %s510_s22 = scalar_lea.hbm %s692_s4, 16 }
  0x47   :  { %p511_p4 = scmp.ne.s32.totalorder %s692_s4, %s510_s22  ;;  %p514_p5 = scmp.lt.u32.totalorder %s510_s22, %s692_s4 }
  0x49   :  { %p516_p6 = pnand %p514_p5, %p511_p4 }
  0x4b   :  { %519 = shalt.err (!%p516_p6)
}
  0x4c   :  { %s520_s27 = scalar_lea.vmem %s67_s9, 16  ;;  %s524_s28 = scalar_lea.vmem %s67_s9, 32 }
  0x4d   :  { %p521_p7 = scmp.ne.s32.totalorder %s67_s9, %s520_s27  ;;  %p525_p8 = scmp.lt.s32.totalorder %s67_s9, %s67_s9 }
  0x4e   :  { %p526_p9 = scmp.lt.s32.totalorder %s524_s28, %s520_s27 }
  0x50   :  { %p527_p10 = por %p526_p9, %p525_p8 }
  0x52   :  { %p528_p11 = pnand %p527_p10, %p521_p7 }
  0x54   :  { %531 = shalt.err (!%p528_p11)
}
  0x55   :  { %69 = dma.hbm_to_vmem [thread:$0]  %s692_s4, 16, %s67_s9, [#allocation9]  }
  0x56   :  { %554 = dma.done.wait [#allocation3], 256  }
  0x57   :  { %555 = vsyncadd [#allocation3], 4294967040 }
  0x58   :  { %556 = dma.done.wait [#allocation6], 1056  }
  0x59   :  { %557 = vsyncadd [#allocation6], 4294966240 }
  0x5a   :  { %558 = dma.done.wait [#allocation9], 4112  }
  0x5b   :  { %559 = vsyncadd [#allocation9], 4294963184  ;;  %v571_v0 = vmov 0.0   ;;  %v88_v1 = vld [vmem:[#allocation5 + $0x8] sm:$0xff]  ;;  %v90_v2 = vld [vmem:[#allocation5 + $0x18] sm:$0xff]  ;;  %vm107_vm0 = vcmask 261120   ;;  %v97_v63 = vlaneseq }
  0x5c   :  { %178 = vmatprep.mubr.f32.mxu0 %v571_v0  ;;  %v87_v3 = vld [vmem:[#allocation5] sm:$0xff]  ;;  %v371_v4 = vpack.c.bf16 %v90_v2, %v88_v1  ;;  %v89_v5 = vld [vmem:[#allocation5 + $0x10] sm:$0xff]  ;;  %v92_v6 = vld [vmem:[#allocation5 + $0x28] sm:$0xff]  ;;  %s572_s4 = smov [#allocation11]  }
  0x5d   :  { %v94_v7 = vld [vmem:[#allocation5 + $0x38] sm:$0xff]  ;;  %v373_v8 = vpack.c.bf16 %v89_v5, %v87_v3  ;;  %v91_v10 = vld [vmem:[#allocation5 + $0x20] sm:$0xff]  ;;  %v93_v11 = vld [vmem:[#allocation5 + $0x30] sm:$0xff]  ;;  %s316_s3 = sshll.u32 %s572_s4, 4  ;;  %s317_s3 = int_to_ptr.vmem [resolvable:$true] %s316_s3 }
  0x5e   :  { %v375_v9 = vpack.c.bf16 %v94_v7, %v92_v6  ;;  %372 = vmatprep.subr.bf16.mxu0 %v371_v4  ;;  %v211_v12 = vld [vmem:[#allocation8 + $0x80] sm:$0xff]  ;;  %v212_v13 = vld [vmem:[#allocation8 + $0x88] sm:$0xff]  ;;  %v377_v14 = vpack.c.bf16 %v93_v11, %v91_v10  ;;  %v213_v18 = vld [vmem:[#allocation8 + $0x90] sm:$0xff]  ;;  %s532_s30 = scalar_lea.vmem %s317_s3, 256  ;;  %p537_p13 = scmp.lt.s32.totalorder %s317_s3, %s317_s3 }
  0x5f   :  { %374 = vmatpush1.bf16.msra.mxu0 %v373_v8  ;;  %v379_v15 = vpack.c.bf16 %v212_v13, %v211_v12  ;;  %v195_v16 = vld [vmem:[#allocation8] sm:$0xff]  ;;  %v196_v17 = vld [vmem:[#allocation8 + $0x8] sm:$0xff]  ;;  %v214_v20 = vld [vmem:[#allocation8 + $0x98] sm:$0xff]  ;;  %p533_p12 = scmp.ne.s32.totalorder %s317_s3, %s532_s30  ;;  %p538_p0 = scmp.lt.s32.totalorder %s532_s30, %s532_s30 }
  0x60   :  { %376 = vmatprep.subr.bf16.mxu0 %v375_v9  ;;  %v381_v19 = vpack.c.bf16 %v196_v17, %v195_v16  ;;  %v197_v21 = vld [vmem:[#allocation8 + $0x10] sm:$0xff]  ;;  %v198_v22 = vld [vmem:[#allocation8 + $0x18] sm:$0xff]  ;;  %v383_v23 = vpack.c.bf16 %v214_v20, %v213_v18  ;;  %v215_v24 = vld [vmem:[#allocation8 + $0xa0] sm:$0xff] }
  0x61   :  { %380 = vmatprep.subr.bf16.mxu1 %v379_v15  ;;  %v216_v25 = vld [vmem:[#allocation8 + $0xa8] sm:$0xff]  ;;  %v385_v26 = vpack.c.bf16 %v198_v22, %v197_v21  ;;  %v199_v29 = vld [vmem:[#allocation8 + $0x20] sm:$0xff]  ;;  %v217_v31 = vld [vmem:[#allocation8 + $0xb0] sm:$0xff]  ;;  %p539_p1 = por %p538_p0, %p537_p13 }
  0x62   :  { %382 = vmatpush3.bf16.msra.mxu1 %v381_v19  ;;  %v85_v27 = vld [vmem:[#allocation2] sm:$0xff]  ;;  %v387_v28 = vpack.c.bf16 %v216_v25, %v215_v24  ;;  %v218_v32 = vld [vmem:[#allocation8 + $0xb8] sm:$0xff]  ;;  %v219_v38 = vld [vmem:[#allocation8 + $0xc0] sm:$0xff] }
  0x63   :  { %378 = vmatpush1.bf16.msra.mxu0 %v377_v14  ;;  %384 = vmatprep.subr.bf16.mxu1 %v383_v23  ;;  %v200_v30 = vld [vmem:[#allocation8 + $0x28] sm:$0xff]  ;;  %v86_v34 = vld [vmem:[#allocation2 + $0x8] sm:$0xff]  ;;  %v391_v35 = vpack.c.bf16 %v218_v32, %v217_v31  ;;  %v203_v42 = vld [vmem:[#allocation8 + $0x40] sm:$0xff]  ;;  %p540_p2 = pnand %p539_p1, %p533_p12 }
  0x64   :  { %v389_v33 = vpack.c.bf16 %v200_v30, %v199_v29  ;;  %v201_v36 = vld [vmem:[#allocation8 + $0x30] sm:$0xff]  ;;  %v202_v37 = vld [vmem:[#allocation8 + $0x38] sm:$0xff]  ;;  %v220_v39 = vld [vmem:[#allocation8 + $0xc8] sm:$0xff] }
  0x65   :  { %v393_v40 = vpack.c.bf16 %v202_v37, %v201_v36  ;;  %v395_v41 = vpack.c.bf16 %v220_v39, %v219_v38  ;;  %v204_v43 = vld [vmem:[#allocation8 + $0x48] sm:$0xff]  ;;  %v221_v44 = vld [vmem:[#allocation8 + $0xd0] sm:$0xff]  ;;  %v222_v45 = vld [vmem:[#allocation8 + $0xd8] sm:$0xff] }
  0x66   :  { %330 = vmatmul.mubr.msk.f32.vlgmr.msra.gmra.mrb[0].mxu0 %vm107_vm0, %v85_v27  ;;  %386 = vmatpush3.bf16.msra.mxu1 %v385_v26  ;;  %v397_v46 = vpack.c.bf16 %v204_v43, %v203_v42  ;;  %v399_v47 = vpack.c.bf16 %v222_v45, %v221_v44  ;;  %v205_v48 = vld [vmem:[#allocation8 + $0x50] sm:$0xff]  ;;  %v206_v49 = vld [vmem:[#allocation8 + $0x58] sm:$0xff]  ;;  %v223_v50 = vld [vmem:[#allocation8 + $0xe0] sm:$0xff] }
  0x67   :  { %184 = vmatprep.mubr.f32.mxu0 %v571_v0  ;;  %388 = vmatprep.subr.bf16.mxu1 %v387_v28  ;;  %v224_v51 = vld [vmem:[#allocation8 + $0xe8] sm:$0xff]  ;;  %v401_v52 = vpack.c.bf16 %v206_v49, %v205_v48  ;;  %v207_v54 = vld [vmem:[#allocation8 + $0x60] sm:$0xff]  ;;  %v225_v57 = vld [vmem:[#allocation8 + $0xf0] sm:$0xff]  ;;  %v98_v0 = vshrl.u32 %v97_v63, 7 }
  0x68   :  { %v403_v53 = vpack.c.bf16 %v224_v51, %v223_v50  ;;  %v208_v55 = vld [vmem:[#allocation8 + $0x68] sm:$0xff]  ;;  %v226_v58 = vld [vmem:[#allocation8 + $0xf8] sm:$0xff]  ;;  %v209_v60 = vld [vmem:[#allocation8 + $0x70] sm:$0xff] }
  0x69   :  { %v405_v56 = vpack.c.bf16 %v208_v55, %v207_v54  ;;  %v407_v59 = vpack.c.bf16 %v226_v58, %v225_v57  ;;  %v210_v61 = vld [vmem:[#allocation8 + $0x78] sm:$0xff]  ;;  %v99_v1 = vsub.s32 0, %v98_v0  ;;  %v103_v3 = vsub.s32 1, %v98_v0  ;;  %v332_v19 = vld [vmem:[#allocation10] ss:$0 sm:$0xff] }
  0x6a   :  { %331 = vmatmul.mubr.msk.f32.gmra.mrb[2].mxu0 %vm107_vm0, %v86_v34  ;;  %390 = vmatpush3.bf16.msra.mxu1 %v389_v33  ;;  %v409_v62 = vpack.c.bf16 %v210_v61, %v209_v60  ;;  %v95_v2 = vld [vmem:[#allocation7] sm:$0x3] }
  0x6b   :  { %392 = vmatprep.subr.bf16.mxu1 %v391_v35  ;;  %v100_v4 = vrot.slane %v95_v2, %v99_v1  ;;  %v104_v5 = vrot.slane %v95_v2, %v103_v3 }
  0x6e   :  { %394 = vmatpush3.bf16.msra.mxu1 %v393_v40 }
  0x6f   :  { %396 = vmatprep.subr.bf16.mxu1 %v395_v41 }
  0x72   :  { %398 = vmatpush3.bf16.msra.mxu1 %v397_v46 }
  0x73   :  { %400 = vmatprep.subr.bf16.mxu1 %v399_v47 }
  0x76   :  { %402 = vmatpush3.bf16.msra.mxu1 %v401_v52 }
  0x77   :  { %404 = vmatprep.subr.bf16.mxu1 %v403_v53 }
  0x7a   :  { %406 = vmatpush3.bf16.msra.mxu1 %v405_v56 }
  0x7b   :  { %408 = vmatprep.subr.bf16.mxu1 %v407_v59 }
  0x7e   :  { %410 = vmatpush3.bf16.msra.mxu1 %v409_v62 }
 0x139   :  { %v180_v6 = vpop.f32.mrb[0].mxu0 }
 0x13a   :  { %v181_v7 = vadd.f32 %v180_v6, %v100_v4  ;;  %v182_v8 = vpop.f32.mrb[1].mxu0 }
 0x13b   :  { %v183_v9 = vadd.f32 %v182_v8, %v104_v5 }
 0x13c   :  { %v191_v12 = vmax.f32 %v181_v7, 0.0 }
 0x13d   :  { %v186_v10 = vpop.f32.mrb[2].mxu0  ;;  %v192_v11 = vmax.f32 %v183_v9, 0.0 }
 0x13e   :  { %v187_v13 = vadd.f32 %v186_v10, %v100_v4  ;;  %v188_v14 = vpop.f32.mrb[3].mxu0 }
 0x13f   :  { %v189_v15 = vadd.f32 %v188_v14, %v104_v5  ;;  %298 = vmatprep.mubr.f32.mxu1 %v192_v11 }
 0x140   :  { %299 = vmatmul.mubr.f32.vlgmr.msra.gmra.mrb[0].mxu1 %v191_v12  ;;  %v193_v17 = vmax.f32 %v187_v13, 0.0 }
 0x141   :  { %v194_v16 = vmax.f32 %v189_v15, 0.0 }
 0x143   :  { %303 = vmatprep.mubr.f32.mxu1 %v194_v16 }
 0x144   :  { %304 = vmatmul.mubr.f32.gmra.mrb[2].mxu1 %v193_v17 }
 0x213   :  { %v365_v18 = vpop.f32.mrb[0].mxu1 }
 0x214   :  { %v366_v20 = vpop.f32.mrb[1].mxu1 }
 0x215   :  { %v367_v21 = vadd.f32 %v366_v20, %v365_v18 }
 0x217   :  { %v301_v22 = vadd.f32 %v367_v21, %v332_v19  ;;  %v368_v23 = vpop.f32.mrb[2].mxu1 }
 0x218   :  { %v369_v24 = vpop.f32.mrb[3].mxu1 }
 0x219   :  { %309 = vst.msk [vmem:[#allocation11] sm:$0xff] %vm107_vm0, %v301_v22  ;;  %v370_v25 = vadd.f32 %v369_v24, %v368_v23 }
 0x21b   :  { %v306_v26 = vadd.f32 %v370_v25, %v332_v19 }
 0x21d   :  { %310 = vst.msk [vmem:[#allocation11 + $0x8] sm:$0xff] %vm107_vm0, %v306_v26 }
 0x21e   :  { %543 = shalt.err (!%p540_p2)
}
 0x21f   :  { %s544_s8 = scalar_lea.hbm %s693_s5, 256 }
 0x220   :  { %p545_p3 = scmp.ne.s32.totalorder %s693_s5, %s544_s8  ;;  %p548_p4 = scmp.lt.u32.totalorder %s544_s8, %s693_s5 }
 0x222   :  { %p550_p5 = pnand %p548_p4, %p545_p3 }
 0x224   :  { %553 = shalt.err (!%p550_p5)
}
 0x225   :  { %322 = dma.vmem_to_hbm [thread:$0]  %s317_s3, 256, %s693_s5, [#allocation4], %s567_s18, %s567_s18, %s568_s19  }
 0x226   :  { %560 = dma.done.wait [#allocation4], 256  }
 0x227   :  { %561 = vsyncadd [#allocation4], 4294967040 }
 0x228   :  { %326 = vsyncpa [#allocation3], 1 }
 0x229   :  { %327 = vsyncpa [#allocation6], 1 }
 0x22a   :  { %328 = vsyncpa [#allocation9], 1 }
 0x22b   :  { %329 = vsyncpa [#allocation4], 1 }

</bundles_post_ra>
